<compile_context>
chip_gen: v5e
topology: v5e:2x2
jax: 0.10.0
libtpu: 0.0.40
codegen_flags: <defaults>
</compile_context>

<pallas_src>
import jax
import jax.numpy as jnp
from jax import lax
from jax.experimental import pallas as pl
from jax.experimental.pallas import tpu as pltpu

# ------------------------- fixed synthetic DAG -------------------------
NODE0_ACT = "tanh"                 # activation of node 0 (dag[-1][0].name)
EDGE_ACTS = ("relu", "sigmoid")    # activations of edges 0->1 and 0->2 (both leaves)
NUM_EDGES = len(EDGE_ACTS)


def _act(name, x):
    if name == "relu":
        return jnp.maximum(x, 0.0)
    if name == "tanh":
        return jnp.tanh(x)
    if name == "sigmoid":
        return jax.nn.sigmoid(x)
    return x  # identity


# ------------------------- kernel 1: fused input projection -------------------------
# x (T*B, E) @ [w_xc | w_xh] (E, 2H) + [b_xc | b_xh]  ->  (T*B, 2H)
def input_proj_kernel(x_ref, w_ref, b_ref, o_ref):
    o_ref[...] = (
        jnp.dot(x_ref[...], w_ref[...], preferred_element_type=jnp.float32)
        + b_ref[...]
    )


def input_projection(x2d, w_fused, b_fused, *, row_tile=256):
    TB, E = x2d.shape
    N = w_fused.shape[-1]
    rt = TB if TB <= row_tile else row_tile
    return pl.pallas_call(
        input_proj_kernel,
        out_shape=jax.ShapeDtypeStruct((TB, N), jnp.float32),
        grid_spec=pltpu.PrefetchScalarGridSpec(
            num_scalar_prefetch=0,
            grid=(pl.cdiv(TB, rt),),
            in_specs=[
                pl.BlockSpec((rt, E), lambda r: (r, 0)),
                pl.BlockSpec((E, N), lambda r: (0, 0)),
                pl.BlockSpec((1, N), lambda r: (0, 0)),
            ],
            out_specs=pl.BlockSpec((rt, N), lambda r: (r, 0)),
        ),
        compiler_params=pltpu.CompilerParams(dimension_semantics=("parallel",)),
    )(x2d, w_fused, b_fused)


# ------------------------- kernel 2: DAG-RNN recurrence -------------------------
# Single un-gridded call; T-step loop unrolled in the body (T is small and static).
def dag_rnn_kernel(xz_ref, h0_ref, wh_ref, wedge_ref, out_ref, hN_ref):
    T = xz_ref.shape[0]
    H = h0_ref.shape[-1]
    wh = wh_ref[...]        # (H, 2H)   = [w_hc | w_hh]
    wedge = wedge_ref[...]  # (H, 2H*NUM_EDGES) = [w_c_e | w_h_e] per edge
    inv_edges = 1.0 / float(NUM_EDGES)

    h = h0_ref[...]         # (B, H)
    for t in range(T):      # unrolled straight-line recurrence
        z = xz_ref[t] + jnp.dot(h, wh, preferred_element_type=jnp.float32)  # (B, 2H)
        c0 = jax.nn.sigmoid(z[:, :H])
        h0 = c0 * _act(NODE0_ACT, z[:, H:]) + (1.0 - c0) * h

        ez = jnp.dot(h0, wedge, preferred_element_type=jnp.float32)         # (B, 4H)
        acc = jnp.zeros_like(h0)
        for e, act_name in enumerate(EDGE_ACTS):
            ce = jax.nn.sigmoid(ez[:, 2 * e * H:(2 * e + 1) * H])
            pre = ez[:, (2 * e + 1) * H:(2 * e + 2) * H]
            acc = acc + ce * _act(act_name, pre) + (1.0 - ce) * h0
        out = acc * inv_edges

        # 'NORM' clip; mask applied twice in the original (output/hidden alias):
        # rows with sum(out^2) > 625 scaled by 625/sum(out^2).  No sqrt needed.
        sumsq = jnp.sum(out * out, axis=-1, keepdims=True)
        scale2 = jnp.where(sumsq > 625.0, 625.0 / jnp.maximum(sumsq, 1e-12), 1.0)
        out = out * scale2

        out_ref[t] = out
        h = out

    hN_ref[...] = h  # written once, at the end


def dag_rnn_recurrence(xz, h0, wh_fused, wedge_fused):
    """xz: (T, B, 2H) precomputed input projections; h0: (B, H)."""
    T, B, _ = xz.shape
    H = h0.shape[-1]
    return pl.pallas_call(
        dag_rnn_kernel,
        out_shape=(
            jax.ShapeDtypeStruct((T, B, H), jnp.float32),
            jax.ShapeDtypeStruct((B, H), jnp.float32),
        ),
    )(xz, h0, wh_fused, wedge_fused)


# ------------------------- kernel 3: tiled decoder (Linear) -------------------------
# out[r, c] = x[r, :] . w[c, :] + b[c]   (weight kept in nn.Linear (V, H) layout)
def decoder_kernel(x_ref, w_ref, b_ref, o_ref):
    o_ref[...] = lax.dot_general(
        x_ref[...], w_ref[...],
        dimension_numbers=(((1,), (1,)), ((), ())),
        preferred_element_type=jnp.float32,
    ) + b_ref[...]


def decode(x2d, w_vh, bias_row, *, row_tile=256, vocab_tile=512):
    TB, H = x2d.shape
    V = w_vh.shape[0]
    rt = TB if TB <= row_tile else row_tile
    vt = V if V <= vocab_tile else vocab_tile
    return pl.pallas_call(
        decoder_kernel,
        out_shape=jax.ShapeDtypeStruct((TB, V), jnp.float32),
        grid_spec=pltpu.PrefetchScalarGridSpec(
            num_scalar_prefetch=0,
            grid=(pl.cdiv(TB, rt), pl.cdiv(V, vt)),
            in_specs=[
                pl.BlockSpec((rt, H), lambda r, c: (r, 0)),
                pl.BlockSpec((vt, H), lambda r, c: (c, 0)),
                pl.BlockSpec((1, vt), lambda r, c: (0, c)),
            ],
            out_specs=pl.BlockSpec((rt, vt), lambda r, c: (r, c)),
        ),
        compiler_params=pltpu.CompilerParams(
            dimension_semantics=("parallel", "parallel")),
    )(x2d, w_vh, bias_row)


# ------------------------- full model forward -------------------------
def rnn_model_forward(params, tokens, hidden):
    """tokens: (T, B) int32; hidden: [ (1, B, H) ] -> (result (T, B, V), new_hidden)."""
    T, B = tokens.shape
    # Embedding lookup (gather) stays in plain JAX glue.
    emb = jnp.take(params["encoder_w"], tokens, axis=0)            # (T, B, E)
    E = emb.shape[-1]
    H = params["wh_fused"].shape[0]

    # Non-recurrent input-path matmuls for the whole sequence in one batched call.
    xz = input_projection(emb.reshape(T * B, E),
                          params["wx_fused"], params["bx_fused"]).reshape(T, B, 2 * H)

    h0 = hidden[0][0]                                              # (B, H)
    raw_output, h_new = dag_rnn_recurrence(xz, h0,
                                           params["wh_fused"], params["wedge_fused"])
    new_hidden = [h_new[None]]                                     # [(1, B, H)]

    decoded = decode(raw_output.reshape(T * B, H),
                     params["decoder_w"], params["decoder_b"][None, :])
    result = decoded.reshape(T, B, -1)
    return result, new_hidden


# ------------------------- pure-JAX reference -------------------------
def reference_forward(params, tokens, hidden):
    emb = jnp.take(params["encoder_w"], tokens, axis=0)
    h = hidden[0][0]
    outs = []
    for t in range(tokens.shape[0]):
        x = emb[t]
        c0 = jax.nn.sigmoid(x @ params["wxc"] + params["bxc"] + h @ params["whc"])
        h0 = c0 * _act(NODE0_ACT, x @ params["wxh"] + params["bxh"] + h @ params["whh"]) \
            + (1.0 - c0) * h
        leaves = []
        for e, a in enumerate(EDGE_ACTS):
            ce = jax.nn.sigmoid(h0 @ params["wc_edges"][e])
            he = ce * _act(a, h0 @ params["wh_edges"][e]) + (1.0 - ce) * h0
            leaves.append(he)
        out = sum(leaves) / float(NUM_EDGES)
        norms = jnp.linalg.norm(out, axis=-1, keepdims=True)
        mask = jnp.where(norms > 25.0, 25.0 / jnp.maximum(norms, 1e-12), 1.0)
        out = out * mask * mask   # mask applied to `hidden` AND `output`, which alias
        h = out
        outs.append(out)
    raw = jnp.stack(outs, axis=0)
    T, B, H = raw.shape
    dec = raw.reshape(T * B, H) @ params["decoder_w"].T + params["decoder_b"]
    return dec.reshape(T, B, -1), [h[None]]


# ------------------------- deterministic parameter init -------------------------
def init_params(key, ntoken, emsize, nhid):
    ks = jax.random.split(key, 10)
    u = lambda k, shape, r: jax.random.uniform(k, shape, jnp.float32, -r, r)
    p = {}
    # RNNModel.init_weights(0.04)
    p["encoder_w"] = u(ks[0], (ntoken, emsize), 0.04)
    p["decoder_w"] = u(ks[1], (ntoken, nhid), 0.04)   # nn.Linear(nhid, ntoken).weight
    p["decoder_b"] = jnp.zeros((ntoken,), jnp.float32)
    # DagCellTorch.init_weights(0.1); stored pre-transposed as (in, out)
    p["wxc"] = u(ks[2], (emsize, nhid), 0.1)
    p["bxc"] = u(ks[3], (1, nhid), 0.1)
    p["wxh"] = u(ks[4], (emsize, nhid), 0.1)
    p["bxh"] = u(ks[5], (1, nhid), 0.1)
    p["whc"] = u(ks[6], (nhid, nhid), 0.1)
    p["whh"] = u(ks[7], (nhid, nhid), 0.1)
    p["wc_edges"] = u(ks[8], (NUM_EDGES, nhid, nhid), 0.1)
    p["wh_edges"] = u(ks[9], (NUM_EDGES, nhid, nhid), 0.1)
    # Fused weights built ONCE here (not per forward call).
    p["wx_fused"] = jnp.concatenate([p["wxc"], p["wxh"]], axis=1)      # (E, 2H)
    p["bx_fused"] = jnp.concatenate([p["bxc"], p["bxh"]], axis=1)      # (1, 2H)
    p["wh_fused"] = jnp.concatenate([p["whc"], p["whh"]], axis=1)      # (H, 2H)
    p["wedge_fused"] = jnp.concatenate(
        [jnp.concatenate([p["wc_edges"][e], p["wh_edges"][e]], axis=1)
         for e in range(NUM_EDGES)], axis=1)                           # (H, 2H*NUM_EDGES)
    return p


if __name__ == "__main__":
    T, B = 8, 8
    NTOKEN, EMSIZE, NHID = 256, 128, 128

    root = jax.random.PRNGKey(0)
    k_params, k_tok = jax.random.split(root)
    params = init_params(k_params, NTOKEN, EMSIZE, NHID)
    tokens = jax.random.randint(k_tok, (T, B), 0, NTOKEN, dtype=jnp.int32)
    hidden = [jnp.zeros((1, B, NHID), jnp.float32)]   # init_hidden for DAGCELL

    result, new_hidden = rnn_model_forward(params, tokens, hidden)
    jax.block_until_ready(result)
    jax.block_until_ready(new_hidden[0])

    ref_result, ref_hidden = reference_forward(params, tokens, hidden)
    assert result.shape == (T, B, NTOKEN)
    assert new_hidden[0].shape == (1, B, NHID)
    assert jnp.allclose(result, ref_result, atol=1e-4, rtol=1e-4)
    assert jnp.allclose(new_hidden[0], ref_hidden[0], atol=1e-4, rtol=1e-4)
    print("KERNEL_OK")
</pallas_src>

<mosaic_0001>
module attributes {stable_mosaic.version = 11 : i64} {
  func.func @input_proj_kernel(%arg0: i32, %arg1: memref<64x128xf32, #tpu.memory_space<vmem>>, %arg2: memref<128x256xf32, #tpu.memory_space<vmem>>, %arg3: memref<1x256xf32, #tpu.memory_space<vmem>>, %arg4: memref<64x256xf32, #tpu.memory_space<vmem>>) attributes {dimension_semantics = [#tpu.dimension_semantics<parallel>], iteration_bounds = array<i64: 1>, scalar_prefetch = 0 : i64, scratch_operands = 0 : i64, tpu.core_type = #tpu.core_type<tc>, window_params = [{transform_indices = @transform_0, window_bounds = array<i64: 64, 128>}, {pipeline_mode = #tpu.pipeline_mode<synchronous>, transform_indices = @transform_1, window_bounds = array<i64: 128, 256>}, {pipeline_mode = #tpu.pipeline_mode<synchronous>, transform_indices = @transform_2, window_bounds = array<i64: 1, 256>}, {transform_indices = @transform_3, window_bounds = array<i64: 64, 256>}]} {
    %c0 = arith.constant 0 : index
    %c0_0 = arith.constant 0 : index
    %0 = vector.load %arg1[%c0, %c0_0] : memref<64x128xf32, #tpu.memory_space<vmem>>, vector<64x128xf32>
    %c0_1 = arith.constant 0 : index
    %c0_2 = arith.constant 0 : index
    %1 = vector.load %arg2[%c0_1, %c0_2] : memref<128x256xf32, #tpu.memory_space<vmem>>, vector<128x256xf32>
    %cst = arith.constant dense<0.000000e+00> : vector<64x256xf32>
    %2 = tpu.matmul %0, %1, %cst {dimension_numbers = #tpu.dot_dimension_numbers<[1], [0], [0], [1], [0, 0, 1, 1], [], []>} : vector<64x128xf32>, vector<128x256xf32>, vector<64x256xf32> -> vector<64x256xf32>
    %c0_3 = arith.constant 0 : index
    %c0_4 = arith.constant 0 : index
    %3 = vector.load %arg3[%c0_3, %c0_4] : memref<1x256xf32, #tpu.memory_space<vmem>>, vector<1x256xf32>
    %4 = vector.broadcast %3 : vector<1x256xf32> to vector<64x256xf32>
    %5 = arith.addf %2, %4 : vector<64x256xf32>
    %c0_5 = arith.constant 0 : index
    %c0_6 = arith.constant 0 : index
    %6 = vector.load %arg4[%c0_5, %c0_6] : memref<64x256xf32, #tpu.memory_space<vmem>>, vector<64x256xf32>
    tpu.vector_store %arg4[%c0_5, %c0_6], %5 {strides = array<i32>} : memref<64x256xf32, #tpu.memory_space<vmem>>, vector<64x256xf32>,
    return
  }
  func.func @transform_0(%arg0: i32) -> (i32, i32) {
    %c0_i32 = arith.constant 0 : i32
    %c0_i32_0 = arith.constant 0 : i32
    return %arg0, %c0_i32 : i32, i32
  }
  func.func @transform_1(%arg0: i32) -> (i32, i32) {
    %c0_i32 = arith.constant 0 : i32
    %c0_i32_0 = arith.constant 0 : i32
    %c0_i32_1 = arith.constant 0 : i32
    return %c0_i32, %c0_i32_0 : i32, i32
  }
  func.func @transform_2(%arg0: i32) -> (i32, i32) {
    %c0_i32 = arith.constant 0 : i32
    %c0_i32_0 = arith.constant 0 : i32
    %c0_i32_1 = arith.constant 0 : i32
    return %c0_i32, %c0_i32_0 : i32, i32
  }
  func.func @transform_3(%arg0: i32) -> (i32, i32) {
    %c0_i32 = arith.constant 0 : i32
    %c0_i32_0 = arith.constant 0 : i32
    return %arg0, %c0_i32 : i32, i32
  }
}

</mosaic_0001>

<bundles_post_ra>
// kernel: tpu_custom_call.1
= control target key start
LH: loop header
LB: loop body
LE: loop exit
PB: predicated region body
PF: predicated region fallthrough
CT: control target
= control target key end

     0   :  { %8 = vsyncpa [#allocation3], 0  ;;  %s412_s0 = inlined_call_operand.hbm [shape: f32[64,128], index: 0, kind: input, shape index: {}]   ;;  %s413_s1 = inlined_call_operand.hbm [shape: f32[128,256], index: 1, kind: input, shape index: {}]   ;;  %s414_s2 = inlined_call_operand.hbm [shape: f32[1,256], index: 2, kind: input, shape index: {}]   ;;  %s415_s3 = inlined_call_operand.hbm [shape: f32[64,256], index: 3, kind: output, shape index: {}]  }
   0x1   :  { %9 = vsyncpa [#allocation6], 0  ;;  %s28_s14 = sshll.u32 %s413_s1, 4  ;;  %s29_s14 = int_to_ptr.hbm [resolvable:$true] %s28_s14 }
   0x2   :  { %10 = vsyncpa [#allocation4], 0  ;;  %s366_s15 = smov [#allocation5]   ;;  %s15_s19 = sshll.u32 %s412_s0, 4  ;;  %s16_s19 = int_to_ptr.hbm [resolvable:$true] %s15_s19 }
   0x3   :  { %s30_s16 = sshll.u32 %s366_s15, 4  ;;  %s367_s20 = smov 256   ;;  %s31_s16 = int_to_ptr.vmem [resolvable:$true] %s30_s16 }
   0x4   :  { %s368_s21 = smov 16   ;;  %s369_s22 = smov [#allocation2]  }
   0x5   :  { %36 = dma.hbm_to_vmem [thread:$0]  %s29_s14, 4096, %s31_s16, [#allocation6], %s367_s20, %s367_s20, %s368_s21  }
   0x6   :  { %s17_s23 = sshll.u32 %s369_s22, 4  ;;  %s370_s1 = smov 128   ;;  %s18_s23 = int_to_ptr.vmem [resolvable:$true] %s17_s23 }
   0x7   :  { %s371_s24 = smov 8   ;;  %s42_s27 = sshll.u32 %s414_s2, 4  ;;  %s43_s27 = int_to_ptr.hbm [resolvable:$true] %s42_s27 }
   0x8   :  { %23 = dma.hbm_to_vmem [thread:$0]  %s16_s19, 1024, %s18_s23, [#allocation3], %s370_s1, %s370_s1, %s371_s24  }
   0x9   :  { %s372_s28 = smov [#allocation7]  }
   0xa   :  { %s44_s0 = sshll.u32 %s372_s28, 4  ;;  %s45_s0 = int_to_ptr.vmem [resolvable:$true] %s44_s0 }
   0xb   :  { %47 = dma.hbm_to_vmem [thread:$0]  %s43_s27, 32, %s45_s0, [#allocation6]  }
   0xc   :  { %360 = dma.done.wait [#allocation3], 1024  }
   0xd   :  { %361 = vsyncadd [#allocation3], 4294966272 }
   0xe   :  { %362 = dma.done.wait [#allocation6], 4128  }
   0xf   :  { %363 = vsyncadd [#allocation6], 4294963168  ;;  %v98_v0 = vld [vmem:[#allocation5 + $0xf0] sm:$0xff]  ;;  %v99_v1 = vld [vmem:[#allocation5 + $0xf8] sm:$0xff]  ;;  %s373_s2 = smov [#allocation8]   ;;  %s210_s5 = sshll.u32 %s415_s3, 4  ;;  %s211_s5 = int_to_ptr.hbm [resolvable:$true] %s210_s5 }
  0x10   :  { %v96_v2 = vld [vmem:[#allocation5 + $0xe0] sm:$0xff]  ;;  %224 = vmatpush.msra.mxu2 %v98_v0  ;;  %240 = vmatpush.msra.mxu3 %v99_v1  ;;  %v97_v3 = vld [vmem:[#allocation5 + $0xe8] sm:$0xff]  ;;  %v94_v4 = vld [vmem:[#allocation5 + $0xd0] sm:$0xff]  ;;  %s208_s29 = sshll.u32 %s373_s2, 4  ;;  %s209_s29 = int_to_ptr.vmem [resolvable:$true] %s208_s29 }
  0x11   :  { %v95_v5 = vld [vmem:[#allocation5 + $0xd8] sm:$0xff]  ;;  %106 = vmatpush.msra.mxu0 %v98_v0  ;;  %147 = vmatpush.msra.mxu1 %v99_v1  ;;  %v92_v6 = vld [vmem:[#allocation5 + $0xc0] sm:$0xff]  ;;  %v93_v7 = vld [vmem:[#allocation5 + $0xc8] sm:$0xff] }
  0x12   :  { %225 = vmatpush.msra.mxu2 %v96_v2  ;;  %241 = vmatpush.msra.mxu3 %v97_v3  ;;  %v90_v8 = vld [vmem:[#allocation5 + $0xb0] sm:$0xff]  ;;  %v91_v9 = vld [vmem:[#allocation5 + $0xb8] sm:$0xff]  ;;  %v88_v10 = vld [vmem:[#allocation5 + $0xa0] sm:$0xff] }
  0x13   :  { %107 = vmatpush.msra.mxu0 %v96_v2  ;;  %148 = vmatpush.msra.mxu1 %v97_v3  ;;  %v89_v11 = vld [vmem:[#allocation5 + $0xa8] sm:$0xff]  ;;  %v86_v12 = vld [vmem:[#allocation5 + $0x90] sm:$0xff]  ;;  %v87_v13 = vld [vmem:[#allocation5 + $0x98] sm:$0xff] }
  0x14   :  { %226 = vmatpush.msra.mxu2 %v94_v4  ;;  %242 = vmatpush.msra.mxu3 %v95_v5  ;;  %v84_v14 = vld [vmem:[#allocation5 + $0x80] sm:$0xff]  ;;  %v85_v15 = vld [vmem:[#allocation5 + $0x88] sm:$0xff]  ;;  %v82_v16 = vld [vmem:[#allocation5 + $0x70] sm:$0xff] }
  0x15   :  { %108 = vmatpush.msra.mxu0 %v94_v4  ;;  %149 = vmatpush.msra.mxu1 %v95_v5  ;;  %v83_v17 = vld [vmem:[#allocation5 + $0x78] sm:$0xff]  ;;  %v80_v18 = vld [vmem:[#allocation5 + $0x60] sm:$0xff]  ;;  %v81_v19 = vld [vmem:[#allocation5 + $0x68] sm:$0xff] }
  0x16   :  { %227 = vmatpush.msra.mxu2 %v92_v6  ;;  %243 = vmatpush.msra.mxu3 %v93_v7  ;;  %v78_v20 = vld [vmem:[#allocation5 + $0x50] sm:$0xff]  ;;  %v79_v21 = vld [vmem:[#allocation5 + $0x58] sm:$0xff]  ;;  %v76_v22 = vld [vmem:[#allocation5 + $0x40] sm:$0xff] }
  0x17   :  { %109 = vmatpush.msra.mxu0 %v92_v6  ;;  %150 = vmatpush.msra.mxu1 %v93_v7  ;;  %v77_v23 = vld [vmem:[#allocation5 + $0x48] sm:$0xff]  ;;  %v74_v24 = vld [vmem:[#allocation5 + $0x30] sm:$0xff]  ;;  %v75_v25 = vld [vmem:[#allocation5 + $0x38] sm:$0xff] }
  0x18   :  { %228 = vmatpush.msra.mxu2 %v90_v8  ;;  %244 = vmatpush.msra.mxu3 %v91_v9  ;;  %v72_v26 = vld [vmem:[#allocation5 + $0x20] sm:$0xff]  ;;  %v73_v27 = vld [vmem:[#allocation5 + $0x28] sm:$0xff]  ;;  %v70_v28 = vld [vmem:[#allocation5 + $0x10] sm:$0xff] }
  0x19   :  { %110 = vmatpush.msra.mxu0 %v90_v8  ;;  %151 = vmatpush.msra.mxu1 %v91_v9  ;;  %v71_v29 = vld [vmem:[#allocation5 + $0x18] sm:$0xff]  ;;  %v68_v30 = vld [vmem:[#allocation5] sm:$0xff]  ;;  %v69_v31 = vld [vmem:[#allocation5 + $0x8] sm:$0xff] }
  0x1a   :  { %229 = vmatpush.msra.mxu2 %v88_v10  ;;  %245 = vmatpush.msra.mxu3 %v89_v11  ;;  %v64_v32 = vld [vmem:[#allocation2 + $0x20] sm:$0xff]  ;;  %v65_v34 = vld [vmem:[#allocation2 + $0x28] sm:$0xff]  ;;  %v66_v36 = vld [vmem:[#allocation2 + $0x30] sm:$0xff] }
  0x1b   :  { %111 = vmatpush.msra.mxu0 %v88_v10  ;;  %152 = vmatpush.msra.mxu1 %v89_v11  ;;  %v60_v33 = vld [vmem:[#allocation2] sm:$0xff]  ;;  %v61_v35 = vld [vmem:[#allocation2 + $0x8] sm:$0xff]  ;;  %v62_v37 = vld [vmem:[#allocation2 + $0x10] sm:$0xff] }
  0x1c   :  { %230 = vmatpush.msra.mxu2 %v86_v12  ;;  %246 = vmatpush.msra.mxu3 %v87_v13  ;;  %v67_v38 = vld [vmem:[#allocation2 + $0x38] sm:$0xff]  ;;  %v100_v40 = vld [vmem:[#allocation7] sm:$0x3] }
  0x1d   :  { %112 = vmatpush.msra.mxu0 %v86_v12  ;;  %153 = vmatpush.msra.mxu1 %v87_v13  ;;  %v63_v39 = vld [vmem:[#allocation2 + $0x18] sm:$0xff]  ;;  %v102_v41 = vperm.slane %v100_v40, 0  ;;  %v103_v42 = vperm.slane %v100_v40, 1 }
  0x1e   :  { %231 = vmatpush.msra.mxu2 %v84_v14  ;;  %247 = vmatpush.msra.mxu3 %v85_v15 }
  0x1f   :  { %113 = vmatpush.msra.mxu0 %v84_v14  ;;  %154 = vmatpush.msra.mxu1 %v85_v15 }
  0x20   :  { %232 = vmatpush.msra.mxu2 %v82_v16  ;;  %248 = vmatpush.msra.mxu3 %v83_v17 }
  0x21   :  { %114 = vmatpush.msra.mxu0 %v82_v16  ;;  %155 = vmatpush.msra.mxu1 %v83_v17 }
  0x22   :  { %233 = vmatpush.msra.mxu2 %v80_v18  ;;  %249 = vmatpush.msra.mxu3 %v81_v19 }
  0x23   :  { %115 = vmatpush.msra.mxu0 %v80_v18  ;;  %156 = vmatpush.msra.mxu1 %v81_v19 }
  0x24   :  { %234 = vmatpush.msra.mxu2 %v78_v20  ;;  %250 = vmatpush.msra.mxu3 %v79_v21 }
  0x25   :  { %116 = vmatpush.msra.mxu0 %v78_v20  ;;  %157 = vmatpush.msra.mxu1 %v79_v21 }
  0x26   :  { %235 = vmatpush.msra.mxu2 %v76_v22  ;;  %251 = vmatpush.msra.mxu3 %v77_v23 }
  0x27   :  { %117 = vmatpush.msra.mxu0 %v76_v22  ;;  %158 = vmatpush.msra.mxu1 %v77_v23 }
  0x28   :  { %236 = vmatpush.msra.mxu2 %v74_v24  ;;  %252 = vmatpush.msra.mxu3 %v75_v25 }
  0x29   :  { %118 = vmatpush.msra.mxu0 %v74_v24  ;;  %159 = vmatpush.msra.mxu1 %v75_v25 }
  0x2a   :  { %237 = vmatpush.msra.mxu2 %v72_v26  ;;  %253 = vmatpush.msra.mxu3 %v73_v27 }
  0x2b   :  { %119 = vmatpush.msra.mxu0 %v72_v26  ;;  %160 = vmatpush.msra.mxu1 %v73_v27 }
  0x2c   :  { %238 = vmatpush.msra.mxu2 %v70_v28  ;;  %254 = vmatpush.msra.mxu3 %v71_v29 }
  0x2d   :  { %120 = vmatpush.msra.mxu0 %v70_v28  ;;  %161 = vmatpush.msra.mxu1 %v71_v29 }
  0x2e   :  { %239 = vmatpush.msra.mxu2 %v68_v30  ;;  %255 = vmatpush.msra.mxu3 %v69_v31 }
  0x2f   :  { %134 = vmatmul.f32.vlgmr.msra.gmra.mxu2 %v64_v32  ;;  %175 = vmatmul.f32.vlgmr.msra.gmra.mxu3 %v64_v32 }
  0x30   :  { %121 = vmatpush.msra.mxu0 %v68_v30  ;;  %162 = vmatpush.msra.mxu1 %v69_v31 }
  0x31   :  { %122 = vmatmul.f32.vlgmr.msra.gmra.mxu0 %v60_v33  ;;  %163 = vmatmul.f32.vlgmr.msra.gmra.mxu1 %v60_v33 }
  0x37   :  { %137 = vmatmul.f32.gmra.mxu2 %v65_v34  ;;  %178 = vmatmul.f32.gmra.mxu3 %v65_v34 }
  0x39   :  { %125 = vmatmul.f32.gmra.mxu0 %v61_v35  ;;  %166 = vmatmul.f32.gmra.mxu1 %v61_v35 }
  0x3f   :  { %140 = vmatmul.f32.gmra.mxu2 %v66_v36  ;;  %181 = vmatmul.f32.gmra.mxu3 %v66_v36 }
  0x41   :  { %128 = vmatmul.f32.gmra.mxu0 %v62_v37  ;;  %169 = vmatmul.f32.gmra.mxu1 %v62_v37 }
  0x47   :  { %143 = vmatmul.f32.gmra.mxu2 %v67_v38  ;;  %184 = vmatmul.f32.gmra.mxu3 %v67_v38 }
  0x49   :  { %131 = vmatmul.f32.gmra.mxu0 %v63_v39  ;;  %172 = vmatmul.f32.gmra.mxu1 %v63_v39 }
  0xae   :  { %v123_v43 = vpop.f32.mrf.mxu0  ;;  %v164_v44 = vpop.f32.mrf.mxu1 }
  0xaf   :  { %v124_v45 = vadd.f32 %v123_v43, %v102_v41  ;;  %v165_v46 = vadd.f32 %v164_v44, %v103_v42 }
  0xb1   :  { %188 = vst [vmem:[#allocation8] sm:$0xff] %v124_v45 }
  0xb2   :  { %v135_v47 = vpop.f32.mrf.mxu2  ;;  %189 = vst [vmem:[#allocation8 + $0x8] sm:$0xff] %v165_v46  ;;  %v176_v48 = vpop.f32.mrf.mxu3 }
  0xb3   :  { %v136_v49 = vadd.f32 %v135_v47, %v102_v41  ;;  %v177_v50 = vadd.f32 %v176_v48, %v103_v42 }
  0xb5   :  { %196 = vst [vmem:[#allocation8 + $0x40] sm:$0xff] %v136_v49 }
  0xb6   :  { %197 = vst [vmem:[#allocation8 + $0x48] sm:$0xff] %v177_v50  ;;  %v126_v51 = vpop.f32.mrf.mxu0  ;;  %v167_v52 = vpop.f32.mrf.mxu1 }
  0xb7   :  { %v127_v53 = vadd.f32 %v126_v51, %v102_v41  ;;  %v168_v54 = vadd.f32 %v167_v52, %v103_v42 }
  0xb9   :  { %190 = vst [vmem:[#allocation8 + $0x10] sm:$0xff] %v127_v53 }
  0xba   :  { %v138_v55 = vpop.f32.mrf.mxu2  ;;  %191 = vst [vmem:[#allocation8 + $0x18] sm:$0xff] %v168_v54  ;;  %v179_v56 = vpop.f32.mrf.mxu3 }
  0xbb   :  { %v139_v57 = vadd.f32 %v138_v55, %v102_v41  ;;  %v180_v58 = vadd.f32 %v179_v56, %v103_v42 }
  0xbd   :  { %198 = vst [vmem:[#allocation8 + $0x50] sm:$0xff] %v139_v57 }
  0xbe   :  { %199 = vst [vmem:[#allocation8 + $0x58] sm:$0xff] %v180_v58  ;;  %v129_v59 = vpop.f32.mrf.mxu0  ;;  %v170_v60 = vpop.f32.mrf.mxu1 }
  0xbf   :  { %v130_v61 = vadd.f32 %v129_v59, %v102_v41  ;;  %v171_v62 = vadd.f32 %v170_v60, %v103_v42 }
  0xc1   :  { %192 = vst [vmem:[#allocation8 + $0x20] sm:$0xff] %v130_v61 }
  0xc2   :  { %v141_v63 = vpop.f32.mrf.mxu2  ;;  %193 = vst [vmem:[#allocation8 + $0x28] sm:$0xff] %v171_v62  ;;  %v182_v0 = vpop.f32.mrf.mxu3 }
  0xc3   :  { %v142_v1 = vadd.f32 %v141_v63, %v102_v41  ;;  %v183_v2 = vadd.f32 %v182_v0, %v103_v42 }
  0xc5   :  { %200 = vst [vmem:[#allocation8 + $0x60] sm:$0xff] %v142_v1 }
  0xc6   :  { %201 = vst [vmem:[#allocation8 + $0x68] sm:$0xff] %v183_v2  ;;  %v132_v3 = vpop.f32.mrf.mxu0  ;;  %v173_v4 = vpop.f32.mrf.mxu1 }
  0xc7   :  { %v133_v5 = vadd.f32 %v132_v3, %v102_v41  ;;  %v174_v6 = vadd.f32 %v173_v4, %v103_v42 }
  0xc9   :  { %194 = vst [vmem:[#allocation8 + $0x30] sm:$0xff] %v133_v5 }
  0xca   :  { %v144_v7 = vpop.f32.mrf.mxu2  ;;  %195 = vst [vmem:[#allocation8 + $0x38] sm:$0xff] %v174_v6  ;;  %v185_v8 = vpop.f32.mrf.mxu3 }
  0xcb   :  { %v145_v9 = vadd.f32 %v144_v7, %v102_v41  ;;  %v186_v10 = vadd.f32 %v185_v8, %v103_v42 }
  0xcd   :  { %202 = vst [vmem:[#allocation8 + $0x70] sm:$0xff] %v145_v9 }
  0xce   :  { %203 = vst [vmem:[#allocation8 + $0x78] sm:$0xff] %v186_v10 }
  0xcf   :  { %216 = dma.vmem_to_hbm [thread:$0]  %s209_s29, 2048, %s211_s5, [#allocation4], %s367_s20, %s367_s20, %s368_s21  }
  0xd0   :  { %364 = dma.done.wait [#allocation4], 2048  }
  0xd1   :  { %365 = vsyncadd [#allocation4], 4294965248 }
  0xd2   :  { %221 = vsyncpa [#allocation3], 1 }
  0xd3   :  { %222 = vsyncpa [#allocation6], 1 }
  0xd4   :  { %223 = vsyncpa [#allocation4], 1 }

</bundles_post_ra>
